<compile_context>
chip_gen: v6e
topology: v6e:2x2x1
jax: 0.10.0
libtpu: 0.0.40
codegen_flags: <defaults>
</compile_context>

<pallas_src>
import jax
import jax.numpy as jnp
from jax import lax
from jax.experimental import pallas as pl
from jax.experimental.pallas import tpu as pltpu

EPS = 1e-5      # PyTorch nn.LayerNorm default
_LANES = 128


def _sublane_multiple(dtype) -> int:
    # f32 -> 8, bf16 -> 16, int8/fp8 -> 32 (sublane packing).
    return {4: 8, 2: 16, 1: 32}.get(jnp.dtype(dtype).itemsize, 8)


def _pick_block_rows(num_rows: int, row_bytes: int, sub: int,
                     target_tile_bytes: int) -> int:
    br = max(1, target_tile_bytes // row_bytes)
    br = min(br, num_rows)
    br = ((br + sub - 1) // sub) * sub     # round up to sublane multiple
    return max(br, sub)


def _ln_rows_kernel(x_ref, w_ref, o_ref):
    # x_ref: (tm, D) tile of independent rows, w_ref: (1, D). bias == 0 folded away.
    x = x_ref[...].astype(jnp.float32)
    mean = jnp.mean(x, axis=-1, keepdims=True)
    xc = x - mean
    var = jnp.mean(xc * xc, axis=-1, keepdims=True)
    inv = lax.rsqrt(var + EPS)
    o_ref[...] = (xc * inv * w_ref[...].astype(jnp.float32)).astype(o_ref.dtype)


def _ln_packed_kernel(x_ref, m_ref, w_ref, o_ref):
    # x_ref: (tm, 128); each 128-lane row packs `pack` logical rows of width
    # D = 128 // pack (contiguous packing, so lane k holds feature k % D of
    # logical row k // D).  m_ref: (128, 128) block-diagonal averaging matrix
    # (1/D inside each DxD block) -> per-logical-row mean, broadcast back to
    # that row's lanes, computed on the MXU.  w_ref: (1, 128) = weight tiled
    # `pack` times.  No cross-row mixing: each output row of x @ M depends
    # only on the same x row, so masked partial blocks stay correct.
    x = x_ref[...].astype(jnp.float32)
    m = m_ref[...]
    mean = jnp.dot(x, m, preferred_element_type=jnp.float32,
                   precision=lax.Precision.HIGHEST)
    xc = x - mean
    var = jnp.dot(xc * xc, m, preferred_element_type=jnp.float32,
                  precision=lax.Precision.HIGHEST)
    inv = lax.rsqrt(var + EPS)
    o_ref[...] = (xc * inv * w_ref[...].astype(jnp.float32)).astype(o_ref.dtype)


def layer_norm_pallas(x, weight, *, target_tile_bytes=1 << 20,
                      vmem_limit_bytes=32 * 1024 * 1024):
    """LayerNorm over the last axis of x (bias == 0, as in the LN module)."""
    orig_shape = x.shape
    D = orig_shape[-1]
    N = 1
    for s in orig_shape[:-1]:
        N *= s
    x2 = x.reshape(N, D)
    dtype = x.dtype
    sub = _sublane_multiple(dtype)
    itemsize = jnp.dtype(dtype).itemsize
    w32 = weight.astype(jnp.float32)

    cp = pltpu.CompilerParams(
        dimension_semantics=("parallel",),
        vmem_limit_bytes=vmem_limit_bytes,
    )

    pack = _LANES // D if (D < _LANES and _LANES % D == 0) else 1
    use_packed = pack > 1 and N >= pack and (N % pack == 0)

    if use_packed:
        L = _LANES
        Np = N // pack
        xp = x2.reshape(Np, L)                      # contiguous -> free, lane-dense
        wp = jnp.tile(w32.reshape(1, D), (1, pack))  # (1, 128)
        lane = jnp.arange(L)
        mavg = jnp.where((lane[:, None] // D) == (lane[None, :] // D),
                         jnp.float32(1.0 / D), jnp.float32(0.0))
        block_rows = _pick_block_rows(Np, L * itemsize, sub, target_tile_bytes)
        grid = (pl.cdiv(Np, block_rows),)
        out = pl.pallas_call(
            _ln_packed_kernel,
            out_shape=jax.ShapeDtypeStruct((Np, L), dtype),
            grid_spec=pltpu.PrefetchScalarGridSpec(
                num_scalar_prefetch=0,
                grid=grid,
                in_specs=[
                    pl.BlockSpec((block_rows, L), lambda i: (i, 0)),
                    pl.BlockSpec((L, L), lambda i: (0, 0)),
                    pl.BlockSpec((1, L), lambda i: (0, 0)),
                ],
                out_specs=pl.BlockSpec((block_rows, L), lambda i: (i, 0)),
            ),
            compiler_params=cp,
        )(xp, mavg, wp)
        return out.reshape(orig_shape)

    # Standard path: one logical row per kernel row (lane dim = full D).
    w2 = w32.reshape(1, D)
    block_rows = _pick_block_rows(N, D * itemsize, sub, target_tile_bytes)
    grid = (pl.cdiv(N, block_rows),)
    out = pl.pallas_call(
        _ln_rows_kernel,
        out_shape=jax.ShapeDtypeStruct((N, D), dtype),
        grid_spec=pltpu.PrefetchScalarGridSpec(
            num_scalar_prefetch=0,
            grid=grid,
            in_specs=[
                pl.BlockSpec((block_rows, D), lambda i: (i, 0)),
                pl.BlockSpec((1, D), lambda i: (0, 0)),
            ],
            out_specs=pl.BlockSpec((block_rows, D), lambda i: (i, 0)),
        ),
        compiler_params=cp,
    )(x2, w2)
    return out.reshape(orig_shape)


def ln_reference(x, weight):
    x32 = x.astype(jnp.float32)
    mean = jnp.mean(x32, axis=-1, keepdims=True)
    var = jnp.mean((x32 - mean) ** 2, axis=-1, keepdims=True)
    return ((x32 - mean) / jnp.sqrt(var + EPS) * weight.astype(jnp.float32)
            ).astype(x.dtype)


if __name__ == "__main__":
    latent_dim = 32
    gamma = 3.0

    # LN.reset_parameters: weight filled with gamma; nn.LayerNorm bias stays 0
    # (the zero bias is folded out of the kernel).
    weight = jnp.full((latent_dim,), gamma, dtype=jnp.float32)

    key = jax.random.PRNGKey(0)
    k0, k1, k2 = jax.random.split(key, 3)

    # Main case (packed lane-dense path: D=32 -> 4 logical rows per 128-lane row).
    x = jax.random.normal(k0, (2, 8, latent_dim), dtype=jnp.float32)
    y = jax.block_until_ready(layer_norm_pallas(x, weight))
    assert y.shape == x.shape
    assert jnp.allclose(y, ln_reference(x, weight), atol=1e-5, rtol=1e-5), \
        "packed-path mismatch vs reference"

    # Row count not divisible by the packing factor -> standard row path with a
    # masked partial last block (no padding copies).
    x_odd = jax.random.normal(k1, (3, 5, latent_dim), dtype=jnp.float32)
    y_odd = jax.block_until_ready(layer_norm_pallas(x_odd, weight))
    assert jnp.allclose(y_odd, ln_reference(x_odd, weight), atol=1e-5, rtol=1e-5), \
        "row-path mismatch vs reference"

    # Wide-feature case (D >= 128): standard lane-dense path.
    d_wide = 256
    w_wide = jnp.full((d_wide,), gamma, dtype=jnp.float32)
    x_wide = jax.random.normal(k2, (2, 4, d_wide), dtype=jnp.float32)
    y_wide = jax.block_until_ready(layer_norm_pallas(x_wide, w_wide))
    assert jnp.allclose(y_wide, ln_reference(x_wide, w_wide), atol=1e-5, rtol=1e-5), \
        "wide-D mismatch vs reference"

    print("KERNEL_OK")
</pallas_src>

<mosaic_0001>
module attributes {stable_mosaic.version = 11 : i64} {
  func.func @_ln_packed_kernel(%arg0: i32, %arg1: memref<8x128xf32, #tpu.memory_space<vmem>>, %arg2: memref<128x128xf32, #tpu.memory_space<vmem>>, %arg3: memref<1x128xf32, #tpu.memory_space<vmem>>, %arg4: memref<8x128xf32, #tpu.memory_space<vmem>>) attributes {dimension_semantics = [#tpu.dimension_semantics<parallel>], iteration_bounds = array<i64: 1>, scalar_prefetch = 0 : i64, scratch_operands = 0 : i64, tpu.core_type = #tpu.core_type<tc>, window_params = [{transform_indices = @transform_0, window_bounds = array<i64: 8, 128>}, {pipeline_mode = #tpu.pipeline_mode<synchronous>, transform_indices = @transform_1, window_bounds = array<i64: 128, 128>}, {pipeline_mode = #tpu.pipeline_mode<synchronous>, transform_indices = @transform_2, window_bounds = array<i64: 1, 128>}, {transform_indices = @transform_3, window_bounds = array<i64: 8, 128>}]} {
    %c0 = arith.constant 0 : index
    %c0_0 = arith.constant 0 : index
    %0 = vector.load %arg1[%c0, %c0_0] : memref<8x128xf32, #tpu.memory_space<vmem>>, vector<8x128xf32>
    %c0_1 = arith.constant 0 : index
    %c0_2 = arith.constant 0 : index
    %1 = vector.load %arg2[%c0_1, %c0_2] : memref<128x128xf32, #tpu.memory_space<vmem>>, vector<128x128xf32>
    %cst = arith.constant dense<0.000000e+00> : vector<8x128xf32>
    %2 = tpu.matmul %0, %1, %cst {dimension_numbers = #tpu.dot_dimension_numbers<[1], [0], [0], [1], [0, 0, 1, 1], [], []>, precision = #tpu.contract_precision<fp32>} : vector<8x128xf32>, vector<128x128xf32>, vector<8x128xf32> -> vector<8x128xf32>
    %3 = arith.subf %0, %2 : vector<8x128xf32>
    %4 = arith.mulf %3, %3 : vector<8x128xf32>
    %cst_3 = arith.constant dense<0.000000e+00> : vector<8x128xf32>
    %5 = tpu.matmul %4, %1, %cst_3 {dimension_numbers = #tpu.dot_dimension_numbers<[1], [0], [0], [1], [0, 0, 1, 1], [], []>, precision = #tpu.contract_precision<fp32>} : vector<8x128xf32>, vector<128x128xf32>, vector<8x128xf32> -> vector<8x128xf32>
    %cst_4 = arith.constant 9.99999974E-6 : f32
    %6 = vector.broadcast %cst_4 : f32 to vector<8x128xf32>
    %7 = arith.addf %5, %6 : vector<8x128xf32>
    %8 = math.rsqrt %7 : vector<8x128xf32>
    %9 = arith.mulf %3, %8 : vector<8x128xf32>
    %c0_5 = arith.constant 0 : index
    %c0_6 = arith.constant 0 : index
    %10 = vector.load %arg3[%c0_5, %c0_6] : memref<1x128xf32, #tpu.memory_space<vmem>>, vector<1x128xf32>
    %11 = vector.broadcast %10 : vector<1x128xf32> to vector<8x128xf32>
    %12 = arith.mulf %9, %11 : vector<8x128xf32>
    %c0_7 = arith.constant 0 : index
    %c0_8 = arith.constant 0 : index
    %13 = vector.load %arg4[%c0_7, %c0_8] : memref<8x128xf32, #tpu.memory_space<vmem>>, vector<8x128xf32>
    tpu.vector_store %arg4[%c0_7, %c0_8], %12 {strides = array<i32>} : memref<8x128xf32, #tpu.memory_space<vmem>>, vector<8x128xf32>,
    return
  }
  func.func @transform_0(%arg0: i32) -> (i32, i32) {
    %c0_i32 = arith.constant 0 : i32
    %c0_i32_0 = arith.constant 0 : i32
    return %arg0, %c0_i32 : i32, i32
  }
  func.func @transform_1(%arg0: i32) -> (i32, i32) {
    %c0_i32 = arith.constant 0 : i32
    %c0_i32_0 = arith.constant 0 : i32
    %c0_i32_1 = arith.constant 0 : i32
    return %c0_i32, %c0_i32_0 : i32, i32
  }
  func.func @transform_2(%arg0: i32) -> (i32, i32) {
    %c0_i32 = arith.constant 0 : i32
    %c0_i32_0 = arith.constant 0 : i32
    %c0_i32_1 = arith.constant 0 : i32
    return %c0_i32, %c0_i32_0 : i32, i32
  }
  func.func @transform_3(%arg0: i32) -> (i32, i32) {
    %c0_i32 = arith.constant 0 : i32
    %c0_i32_0 = arith.constant 0 : i32
    return %arg0, %c0_i32 : i32, i32
  }
}

</mosaic_0001>

<bundles_post_ra>
// kernel: tpu_custom_call.1
= control target key start
LH: loop header
LB: loop body
LE: loop exit
PB: predicated region body
PF: predicated region fallthrough
CT: control target
= control target key end

     0   :  { %8 = vsyncpa [#allocation3], 0  ;;  %s2758_s0 = inlined_call_operand.hbm [shape: f32[4,128], index: 0, kind: input, shape index: {}]   ;;  %s2759_s1 = inlined_call_operand.hbm [shape: f32[128,128], index: 1, kind: input, shape index: {}]   ;;  %s2760_s2 = inlined_call_operand.vmem [shape: f32[1,128], index: 2, kind: input, shape index: {}]   ;;  %s2761_s3 = inlined_call_operand.hbm [shape: f32[4,128], index: 3, kind: output, shape index: {}]  }
   0x1   :  { %9 = vsyncpa [#allocation6], 0 }
   0x2   :  { %10 = vsyncpa [#allocation4], 0 }
   0x3   :  { %15 = vsyncadd [#allocation3], 64  ;;  %s2075_s12 = smov [#allocation2]  }
   0x4   :  { %s16_s13 = sshll.u32 %s2075_s12, 4  ;;  %s17_s13 = int_to_ptr.vmem [resolvable:$true] %s16_s13 }
   0x5   :  { %s2017_s14 = scalar_lea.vmem %s17_s13, 64  ;;  %s2021_s15 = scalar_lea.vmem %s17_s13, 128 }
   0x6   :  { %p2018_p0 = scmp.ne.s32.totalorder %s17_s13, %s2017_s14  ;;  %p2022_p1 = scmp.lt.s32.totalorder %s17_s13, %s17_s13 }
   0x7   :  { %p2023_p2 = scmp.lt.s32.totalorder %s2021_s15, %s2017_s14 }
   0x9   :  { %p2024_p3 = por %p2023_p2, %p2022_p1 }
   0xb   :  { %p2025_p4 = pnand %p2024_p3, %p2018_p0 }
   0xd   :  { %2028 = shalt.err (!%p2025_p4)
}
   0xe   :  { %s2076_s16 = smov 64   ;;  %s2077_s17 = smov 4  }
   0xf   :  { %22 = dma.hbm_to_vmem [thread:$0]  %s2758_s0, 64, %s17_s13, [#allocation3], %s2076_s16, %s2076_s16, %s2077_s17  }
  0x10   :  { %s2078_s20 = smov [#allocation5]  }
  0x11   :  { %s28_s21 = sshll.u32 %s2078_s20, 4  ;;  %s29_s21 = int_to_ptr.vmem [resolvable:$true] %s28_s21 }
  0x12   :  { %s2037_s22 = scalar_lea.vmem %s29_s21, 2048  ;;  %p2042_p6 = scmp.lt.s32.totalorder %s29_s21, %s29_s21 }
  0x13   :  { %p2038_p5 = scmp.ne.s32.totalorder %s29_s21, %s2037_s22  ;;  %p2043_p7 = scmp.lt.s32.totalorder %s2037_s22, %s2037_s22 }
  0x15   :  { %p2044_p8 = por %p2043_p7, %p2042_p6 }
  0x17   :  { %p2045_p9 = pnand %p2044_p8, %p2038_p5 }
  0x19   :  { %2048 = shalt.err (!%p2045_p9)
}
  0x1a   :  { %s2079_s23 = smov 128   ;;  %s2080_s24 = smov 8  }
  0x1b   :  { %34 = dma.hbm_to_vmem [thread:$0]  %s2759_s1, 2048, %s29_s21, [#allocation6], %s2079_s23, %s2079_s23, %s2080_s24  }
  0x1c   :  { %2069 = dma.done.wait [#allocation3], 128  }
  0x1d   :  { %2070 = vsyncadd [#allocation3], 4294967168 }
  0x1e   :  { %2071 = dma.done.wait [#allocation6], 2048  }
  0x1f   :  { %2072 = vsyncadd [#allocation6], 4294965248  ;;  %v2081_v0 = vmov 0.0   ;;  %vm2082_vm0 = vmmov 0   ;;  %v59_v1 = vld [vmem:[#allocation5 + $0x78] sm:$0xff]  ;;  %v58_v2 = vld [vmem:[#allocation5 + $0x70] sm:$0xff] }
  0x20   :  { %1578 = vmatprep.subr.mxu0 %v2081_v0  ;;  %1613 = vmatprep.subr.mxu1 %v2081_v0  ;;  %v57_v3 = vld [vmem:[#allocation5 + $0x68] sm:$0xff]  ;;  %v2119_v4 = vand.u32 4294901760, %v59_v1  ;;  %v2121_v5 = vand.u32 4294901760, %v58_v2  ;;  %v56_v7 = vld [vmem:[#allocation5 + $0x60] sm:$0xff]  ;;  %v55_v8 = vld [vmem:[#allocation5 + $0x58] sm:$0xff] }
  0x21   :  { %1610 = vmatprep.mubr.msk.f32.mxu0 %vm2082_vm0, %v2081_v0  ;;  %1645 = vmatprep.mubr.msk.f32.mxu1 %vm2082_vm0, %v2081_v0  ;;  %v2123_v6 = vand.u32 4294901760, %v57_v3  ;;  %v54_v9 = vld [vmem:[#allocation5 + $0x50] sm:$0xff]  ;;  %v2125_v10 = vand.u32 4294901760, %v56_v7  ;;  %v2127_v11 = vand.u32 4294901760, %v55_v8  ;;  %v53_v13 = vld [vmem:[#allocation5 + $0x48] sm:$0xff]  ;;  %v52_v14 = vld [vmem:[#allocation5 + $0x40] sm:$0xff] }
  0x22   :  { %v2129_v12 = vand.u32 4294901760, %v54_v9  ;;  %1579 = vmatpush3.msra.mxu0 %v2119_v4  ;;  %v2133_v15 = vsub.f32 %v59_v1, %v2119_v4  ;;  %v2136_v16 = vsub.f32 %v58_v2, %v2121_v5  ;;  %v2138_v17 = vand.u32 4294901760, %v53_v13  ;;  %v51_v19 = vld [vmem:[#allocation5 + $0x38] sm:$0xff]  ;;  %v50_v26 = vld [vmem:[#allocation5 + $0x30] sm:$0xff]  ;;  %v49_v36 = vld [vmem:[#allocation5 + $0x28] sm:$0xff] }
  0x23   :  { %v2141_v18 = vsub.f32 %v57_v3, %v2123_v6  ;;  %1580 = vmatprep.subr.mxu0 %v2081_v0  ;;  %v2145_v20 = vsub.f32 %v56_v7, %v2125_v10  ;;  %v2148_v21 = vsub.f32 %v55_v8, %v2127_v11  ;;  %v2160_v25 = vand.u32 4294901760, %v52_v14  ;;  %v48_v41 = vld [vmem:[#allocation5 + $0x20] sm:$0xff]  ;;  %v47_v49 = vld [vmem:[#allocation5 + $0x18] sm:$0xff]  ;;  %v46_v54 = vld [vmem:[#allocation5 + $0x10] sm:$0xff] }
  0x24   :  { %1581 = vmatpush3.msra.mxu0 %v2121_v5  ;;  %v2152_v22 = vand.u32 4294901760, %v2133_v15  ;;  %v2155_v23 = vand.u32 4294901760, %v2136_v16  ;;  %v2166_v28 = vand.u32 4294901760, %v51_v19  ;;  %v2172_v30 = vsub.f32 %v54_v9, %v2129_v12  ;;  %v2219_v50 = vld [vmem:[#allocation2] sm:$0xff]  ;;  %v45_v60 = vld [vmem:[#allocation5 + $0x8] sm:$0xff]  ;;  %v44_v7 = vld [vmem:[#allocation5] sm:$0xff] }
  0x25   :  { %v2158_v24 = vand.u32 4294901760, %v2141_v18  ;;  %1582 = vmatprep.subr.mxu0 %v2081_v0  ;;  %v2164_v27 = vand.u32 4294901760, %v2145_v20  ;;  %v2169_v29 = vand.u32 4294901760, %v2148_v21  ;;  %v2182_v34 = vsub.f32 %v53_v13, %v2138_v17  ;;  %2774 = vst [vmem:[#allocation11_spill] sm:$0xff] %v2219_v50 }
  0x26   :  { %1583 = vmatpush3.msra.mxu0 %v2123_v6  ;;  %v155_v31 = vsub.f32 %v2133_v15, %v2152_v22  ;;  %v162_v32 = vsub.f32 %v2136_v16, %v2155_v23  ;;  %v2185_v35 = vand.u32 4294901760, %v50_v26  ;;  %v2195_v40 = vand.u32 4294901760, %v2172_v30 }
  0x27   :  { %v169_v33 = vsub.f32 %v2141_v18, %v2158_v24  ;;  %1584 = vmatprep.subr.mxu0 %v2081_v0  ;;  %v176_v39 = vsub.f32 %v2145_v20, %v2164_v27  ;;  %v183_v42 = vsub.f32 %v2148_v21, %v2169_v29  ;;  %v2201_v43 = vsub.f32 %v52_v14, %v2160_v25 }
  0x28   :  { %1585 = vmatpush3.msra.mxu0 %v2125_v10  ;;  %v2188_v37 = vand.u32 4294901760, %v155_v31  ;;  %v2190_v38 = vand.u32 4294901760, %v162_v32  ;;  %v2207_v45 = vand.u32 4294901760, %v49_v36  ;;  %v2210_v46 = vand.u32 4294901760, %v2182_v34 }
  0x29   :  { %1586 = vmatprep.subr.mxu0 %v2081_v0  ;;  %v2205_v44 = vand.u32 4294901760, %v169_v33  ;;  %v2213_v47 = vsub.f32 %v51_v19, %v2166_v28  ;;  %v2217_v48 = vand.u32 4294901760, %v48_v41  ;;  %v2223_v51 = vand.u32 4294901760, %v176_v39 }
  0x2a   :  { %1587 = vmatpush3.msra.mxu0 %v2127_v11  ;;  %1614 = vmatpush3.msra.mxu1 %v2188_v37  ;;  %v190_v52 = vsub.f32 %v2172_v30, %v2195_v40  ;;  %v2228_v53 = vand.u32 4294901760, %v2201_v43  ;;  %v2231_v55 = vsub.f32 %v50_v26, %v2185_v35  ;;  %v2235_v56 = vand.u32 4294901760, %v183_v42 }
  0x2b   :  { %1588 = vmatprep.subr.mxu0 %v2081_v0  ;;  %1615 = vmatprep.subr.mxu1 %v2081_v0  ;;  %2775 = vst [vmem:[#allocation12_spill] sm:$0xff] %v2223_v51  ;;  %v2238_v57 = vand.u32 4294901760, %v2213_v47  ;;  %v197_v58 = vsub.f32 %v2182_v34, %v2210_v46  ;;  %v2244_v59 = vand.u32 4294901760, %v47_v49  ;;  %v2247_v61 = vsub.f32 %v49_v36, %v2207_v45 }
  0x2c   :  { %1589 = vmatpush3.msra.mxu0 %v2129_v12  ;;  %1616 = vmatpush3.msra.mxu1 %v2190_v38  ;;  %2776 = vst [vmem:[#allocation13_spill] sm:$0xff] %v2235_v56  ;;  %v2250_v62 = vand.u32 4294901760, %v2219_v50  ;;  %v2254_v63 = vand.u32 4294901760, %v46_v54  ;;  %v2258_v1 = vand.u32 4294901760, %v190_v52  ;;  %v204_v2 = vsub.f32 %v2201_v43, %v2228_v53 }
  0x2d   :  { %1590 = vmatprep.subr.mxu0 %v2081_v0  ;;  %1617 = vmatprep.subr.mxu1 %v2081_v0  ;;  %v2263_v3 = vand.u32 4294901760, %v2231_v55  ;;  %v2266_v8 = vsub.f32 %v48_v41, %v2217_v48  ;;  %v211_v9 = vsub.f32 %v2213_v47, %v2238_v57  ;;  %v2272_v13 = vand.u32 4294901760, %v45_v60 }
  0x2e   :  { %1591 = vmatpush3.msra.mxu0 %v2138_v17  ;;  %1618 = vmatpush3.msra.mxu1 %v2205_v44  ;;  %2777 = vst [vmem:[#allocation14_spill] sm:$0xff] %v2258_v1  ;;  %v2276_v14 = vand.u32 4294901760, %v197_v58  ;;  %v2279_v19 = vand.u32 4294901760, %v2247_v61  ;;  %v2283_v26 = vsub.f32 %v2219_v50, %v2250_v62  ;;  %v2286_v31 = vsub.f32 %v47_v49, %v2244_v59 }
  0x2f   :  { %1592 = vmatprep.subr.mxu0 %v2081_v0  ;;  %1619 = vmatprep.subr.mxu1 %v2081_v0  ;;  %v2290_v32 = vand.u32 4294901760, %v44_v7  ;;  %v2294_v33 = vand.u32 4294901760, %v204_v2  ;;  %v218_v36 = vsub.f32 %v2231_v55, %v2263_v3  ;;  %v2299_v39 = vand.u32 4294901760, %v2266_v8 }
  0x30   :  { %1593 = vmatpush3.msra.mxu0 %v2160_v25  ;;  %1620 = vmatpush3.msra.mxu1 %v2223_v51  ;;  %2778 = vst [vmem:[#allocation15_spill] sm:$0xff] %v2276_v14  ;;  %v2302_v41 = vsub.f32 %v46_v54, %v2254_v63  ;;  %v2306_v42 = vand.u32 4294901760, %v211_v9  ;;  %v225_v49 = vsub.f32 %v2247_v61, %v2279_v19  ;;  %v2314_v58 = vand.u32 4294901760, %v2286_v31 }
  0x31   :  { %1594 = vmatprep.subr.mxu0 %v2081_v0  ;;  %1621 = vmatprep.subr.mxu1 %v2081_v0  ;;  %2779 = vst [vmem:[#allocation16_spill] sm:$0xff] %v2294_v33  ;;  %v2317_v54 = vsub.f32 %v45_v60, %v2272_v13  ;;  %v2323_v2 = vand.u32 4294901760, %v218_v36  ;;  %v232_v9 = vsub.f32 %v2266_v8, %v2299_v39  ;;  %v2784_v36 = vand.u32 4294901760, %v2283_v26 }
  0x32   :  { %1595 = vmatpush3.msra.mxu0 %v2166_v28  ;;  %1622 = vmatpush3.msra.mxu1 %v2235_v56  ;;  %2780 = vst [vmem:[#allocation17_spill] sm:$0xff] %v2306_v42  ;;  %2781 = vst [vmem:[#allocation18_spill] sm:$0xff] %v2314_v58  ;;  %v2328_v52 = vand.u32 4294901760, %v2302_v41  ;;  %v2331_v50 = vsub.f32 %v44_v7, %v2290_v32  ;;  %v2337_v60 = vand.u32 4294901760, %v225_v49 }
  0x33   :  { %1596 = vmatprep.subr.mxu0 %v2081_v0  ;;  %1623 = vmatprep.subr.mxu1 %v2081_v0  ;;  %2782 = vst [vmem:[#allocation19_spill] sm:$0xff] %v2323_v2  ;;  %v2345_v7 = vand.u32 4294901760, %v2317_v54  ;;  %v2351_v49 = vand.u32 4294901760, %v232_v9 }
  0x34   :  { %1597 = vmatpush3.msra.mxu0 %v2185_v35  ;;  %1624 = vmatpush3.msra.mxu1 %v2258_v1  ;;  %2783 = vst [vmem:[#allocation20_spill] sm:$0xff] %v2328_v52 }
  0x35   :  { %1598 = vmatprep.subr.mxu0 %v2081_v0  ;;  %1625 = vmatprep.subr.mxu1 %v2081_v0  ;;  %2785 = vst [vmem:[#allocation21_spill] sm:$0xff] %v2345_v7  ;;  %v253_v9 = vsub.f32 %v2317_v54, %v2345_v7 }
  0x36   :  { %1599 = vmatpush3.msra.mxu0 %v2207_v45  ;;  %1626 = vmatpush3.msra.mxu1 %v2276_v14  ;;  %v239_v14 = vsub.f32 %v2286_v31, %v2314_v58 }
  0x37   :  { %1600 = vmatprep.subr.mxu0 %v2081_v0  ;;  %1627 = vmatprep.subr.mxu1 %v2081_v0 }
  0x38   :  { %1601 = vmatpush3.msra.mxu0 %v2217_v48  ;;  %1628 = vmatpush3.msra.mxu1 %v2294_v33  ;;  %v144_v33 = vsub.f32 %v2283_v26, %v2784_v36  ;;  %v2356_v36 = vand.u32 4294901760, %v2331_v50  ;;  %v2362_v56 = vand.u32 4294901760, %v239_v14  ;;  %v2377_v14 = vand.u32 4294901760, %v253_v9 }
  0x39   :  { %1602 = vmatprep.subr.mxu0 %v2081_v0  ;;  %1629 = vmatprep.subr.mxu1 %v2081_v0 }
  0x3a   :  { %1603 = vmatpush3.msra.mxu0 %v2244_v59  ;;  %1630 = vmatpush3.msra.mxu1 %v2306_v42  ;;  %v246_v42 = vsub.f32 %v2302_v41, %v2328_v52  ;;  %2786 = vst [vmem:[#allocation22_spill] sm:$0xff] %v2356_v36  ;;  %v145_v1 = vand.u32 4294901760, %v144_v33  ;;  %v260_v51 = vsub.f32 %v2331_v50, %v2356_v36 }
  0x3b   :  { %1604 = vmatprep.subr.mxu0 %v2081_v0  ;;  %1631 = vmatprep.subr.mxu1 %v2081_v0 }
  0x3c   :  { %1605 = vmatpush3.msra.mxu0 %v2254_v63  ;;  %1632 = vmatpush3.msra.mxu1 %v2323_v2  ;;  %v2370_v2 = vand.u32 4294901760, %v246_v42  ;;  %v2383_v33 = vand.u32 4294901760, %v260_v51  ;;  %v2787_v51 = vand.u32 4294901760, %v2283_v26  ;;  %v2794_v42 = vld [vmem:[#allocation19_spill] sm:$0xff] }
  0x3d   :  { %1606 = vmatprep.subr.mxu0 %v2081_v0  ;;  %1633 = vmatprep.subr.mxu1 %v2081_v0 }
  0x3e   :  { %1607 = vmatpush3.msra.mxu0 %v2272_v13  ;;  %1634 = vmatpush3.msra.mxu1 %v2337_v60 }
  0x3f   :  { %1608 = vmatprep.subr.mxu0 %v2081_v0  ;;  %1635 = vmatprep.subr.mxu1 %v2081_v0 }
  0x40   :  { %1609 = vmatpush3.msra.mxu0 %v2290_v32  ;;  %1636 = vmatpush3.msra.mxu1 %v2351_v49 }
  0x41   :  { %1637 = vmatprep.subr.mxu1 %v2081_v0  ;;  %1648 = vmatprep.subr.mxu0 %v2081_v0 }
  0x42   :  { %1611 = vmatmul.mubr.f32.vlgmr.msra.gmra.mxu0 %v145_v1  ;;  %1638 = vmatpush3.msra.mxu1 %v2362_v56  ;;  %v2792_v1 = vld [vmem:[#allocation16_spill] sm:$0xff] }
  0x43   :  { %1649 = vmatpush3.msra.mxu0 %v2133_v15  ;;  %1639 = vmatprep.subr.mxu1 %v2081_v0 }
  0x44   :  { %1650 = vmatprep.subr.mxu0 %v2081_v0  ;;  %1640 = vmatpush3.msra.mxu1 %v2370_v2 }
  0x45   :  { %1651 = vmatpush3.msra.mxu0 %v2136_v16  ;;  %1641 = vmatprep.subr.mxu1 %v2081_v0 }
  0x46   :  { %1652 = vmatprep.subr.mxu0 %v2081_v0  ;;  %1642 = vmatpush3.msra.mxu1 %v2377_v14 }
  0x47   :  { %1653 = vmatpush3.msra.mxu0 %v2141_v18  ;;  %1643 = vmatprep.subr.mxu1 %v2081_v0 }
  0x48   :  { %1654 = vmatprep.subr.mxu0 %v2081_v0  ;;  %1644 = vmatpush3.msra.mxu1 %v2383_v33 }
  0x49   :  { %1655 = vmatpush3.msra.mxu0 %v2145_v20  ;;  %1646 = vmatmul.mubr.f32.vlgmr.msra.gmra.mxu1 %v2250_v62 }
  0x4a   :  { %1656 = vmatprep.subr.mxu0 %v2081_v0  ;;  %1683 = vmatprep.subr.mxu1 %v2081_v0 }
  0x4b   :  { %1657 = vmatpush3.msra.mxu0 %v2148_v21  ;;  %1684 = vmatpush3.msra.mxu1 %v2119_v4 }
  0x4c   :  { %1658 = vmatprep.subr.mxu0 %v2081_v0  ;;  %1685 = vmatprep.subr.mxu1 %v2081_v0 }
  0x4d   :  { %1659 = vmatpush3.msra.mxu0 %v2172_v30  ;;  %1686 = vmatpush3.msra.mxu1 %v2121_v5 }
  0x4e   :  { %1660 = vmatprep.subr.mxu0 %v2081_v0  ;;  %1687 = vmatprep.subr.mxu1 %v2081_v0 }
  0x4f   :  { %1661 = vmatpush3.msra.mxu0 %v2182_v34  ;;  %1688 = vmatpush3.msra.mxu1 %v2123_v6 }
  0x50   :  { %1662 = vmatprep.subr.mxu0 %v2081_v0  ;;  %1689 = vmatprep.subr.mxu1 %v2081_v0 }
  0x51   :  { %1663 = vmatpush3.msra.mxu0 %v2201_v43  ;;  %1690 = vmatpush3.msra.mxu1 %v2125_v10 }
  0x52   :  { %1664 = vmatprep.subr.mxu0 %v2081_v0  ;;  %1691 = vmatprep.subr.mxu1 %v2081_v0 }
  0x53   :  { %1665 = vmatpush3.msra.mxu0 %v2213_v47  ;;  %1692 = vmatpush3.msra.mxu1 %v2127_v11 }
  0x54   :  { %1666 = vmatprep.subr.mxu0 %v2081_v0  ;;  %1693 = vmatprep.subr.mxu1 %v2081_v0 }
  0x55   :  { %1667 = vmatpush3.msra.mxu0 %v2231_v55  ;;  %1694 = vmatpush3.msra.mxu1 %v2129_v12 }
  0x56   :  { %1668 = vmatprep.subr.mxu0 %v2081_v0  ;;  %1695 = vmatprep.subr.mxu1 %v2081_v0 }
  0x57   :  { %1669 = vmatpush3.msra.mxu0 %v2247_v61  ;;  %1696 = vmatpush3.msra.mxu1 %v2138_v17 }
  0x58   :  { %1670 = vmatprep.subr.mxu0 %v2081_v0  ;;  %1697 = vmatprep.subr.mxu1 %v2081_v0 }
  0x59   :  { %1671 = vmatpush3.msra.mxu0 %v2266_v8  ;;  %1698 = vmatpush3.msra.mxu1 %v2160_v25 }
  0x5a   :  { %1672 = vmatprep.subr.mxu0 %v2081_v0  ;;  %1699 = vmatprep.subr.mxu1 %v2081_v0 }
  0x5b   :  { %1673 = vmatpush3.msra.mxu0 %v2286_v31  ;;  %1700 = vmatpush3.msra.mxu1 %v2166_v28 }
  0x5c   :  { %1674 = vmatprep.subr.mxu0 %v2081_v0  ;;  %1701 = vmatprep.subr.mxu1 %v2081_v0 }
  0x5d   :  { %1675 = vmatpush3.msra.mxu0 %v2302_v41  ;;  %1702 = vmatpush3.msra.mxu1 %v2185_v35 }
  0x5e   :  { %1676 = vmatprep.subr.mxu0 %v2081_v0  ;;  %1703 = vmatprep.subr.mxu1 %v2081_v0 }
  0x5f   :  { %1677 = vmatpush3.msra.mxu0 %v2317_v54  ;;  %1704 = vmatpush3.msra.mxu1 %v2207_v45 }
  0x60   :  { %1678 = vmatprep.subr.mxu0 %v2081_v0  ;;  %1705 = vmatprep.subr.mxu1 %v2081_v0 }
  0x61   :  { %1679 = vmatpush3.msra.mxu0 %v2331_v50  ;;  %1680 = vmatprep.mubr.msk.f32.mxu0 %vm2082_vm0, %v2081_v0 }
  0x62   :  { %1706 = vmatpush3.msra.mxu1 %v2217_v48  ;;  %1681 = vmatmul.mubr.f32.vlgmr.msra.gmra.mxu0 %v2283_v26  ;;  %v2793_v26 = vld [vmem:[#allocation17_spill] sm:$0xff] }
  0x63   :  { %1707 = vmatprep.subr.mxu1 %v2081_v0  ;;  %1718 = vmatprep.subr.mxu0 %v2081_v0 }
  0x64   :  { %1708 = vmatpush3.msra.mxu1 %v2244_v59  ;;  %1719 = vmatpush3.msra.mxu0 %v2152_v22 }
  0x65   :  { %1709 = vmatprep.subr.mxu1 %v2081_v0  ;;  %1720 = vmatprep.subr.mxu0 %v2081_v0 }
  0x66   :  { %1710 = vmatpush3.msra.mxu1 %v2254_v63  ;;  %1721 = vmatpush3.msra.mxu0 %v2155_v23 }
  0x67   :  { %1711 = vmatprep.subr.mxu1 %v2081_v0  ;;  %1722 = vmatprep.subr.mxu0 %v2081_v0 }
  0x68   :  { %1712 = vmatpush3.msra.mxu1 %v2272_v13  ;;  %1723 = vmatpush3.msra.mxu0 %v2158_v24 }
  0x69   :  { %1713 = vmatprep.subr.mxu1 %v2081_v0  ;;  %1724 = vmatprep.subr.mxu0 %v2081_v0 }
  0x6a   :  { %1714 = vmatpush3.msra.mxu1 %v2290_v32  ;;  %1715 = vmatprep.mubr.msk.f32.mxu1 %vm2082_vm0, %v2081_v0 }
  0x6b   :  { %1725 = vmatpush3.msra.mxu0 %v2164_v27  ;;  %1716 = vmatmul.mubr.f32.vlgmr.msra.gmra.mxu1 %v2787_v51 }
  0x6c   :  { %1726 = vmatprep.subr.mxu0 %v2081_v0  ;;  %1753 = vmatprep.subr.mxu1 %v2081_v0 }
  0x6d   :  { %1727 = vmatpush3.msra.mxu0 %v2169_v29  ;;  %1754 = vmatpush3.msra.mxu1 %v2119_v4 }
  0x6e   :  { %1728 = vmatprep.subr.mxu0 %v2081_v0  ;;  %1755 = vmatprep.subr.mxu1 %v2081_v0 }
  0x6f   :  { %1729 = vmatpush3.msra.mxu0 %v2195_v40  ;;  %1756 = vmatpush3.msra.mxu1 %v2121_v5 }
  0x70   :  { %1730 = vmatprep.subr.mxu0 %v2081_v0  ;;  %1757 = vmatprep.subr.mxu1 %v2081_v0 }
  0x71   :  { %1731 = vmatpush3.msra.mxu0 %v2210_v46  ;;  %1758 = vmatpush3.msra.mxu1 %v2123_v6 }
  0x72   :  { %1732 = vmatprep.subr.mxu0 %v2081_v0  ;;  %1759 = vmatprep.subr.mxu1 %v2081_v0 }
  0x73   :  { %1733 = vmatpush3.msra.mxu0 %v2228_v53  ;;  %1760 = vmatpush3.msra.mxu1 %v2125_v10 }
  0x74   :  { %1734 = vmatprep.subr.mxu0 %v2081_v0  ;;  %1761 = vmatprep.subr.mxu1 %v2081_v0 }
  0x75   :  { %1735 = vmatpush3.msra.mxu0 %v2238_v57  ;;  %1762 = vmatpush3.msra.mxu1 %v2127_v11 }
  0x76   :  { %1736 = vmatprep.subr.mxu0 %v2081_v0  ;;  %1763 = vmatprep.subr.mxu1 %v2081_v0 }
  0x77   :  { %1737 = vmatpush3.msra.mxu0 %v2263_v3  ;;  %1764 = vmatpush3.msra.mxu1 %v2129_v12 }
  0x78   :  { %1738 = vmatprep.subr.mxu0 %v2081_v0  ;;  %1765 = vmatprep.subr.mxu1 %v2081_v0 }
  0x79   :  { %1739 = vmatpush3.msra.mxu0 %v2279_v19  ;;  %1766 = vmatpush3.msra.mxu1 %v2138_v17 }
  0x7a   :  { %1740 = vmatprep.subr.mxu0 %v2081_v0  ;;  %1767 = vmatprep.subr.mxu1 %v2081_v0 }
  0x7b   :  { %1741 = vmatpush3.msra.mxu0 %v2299_v39  ;;  %1768 = vmatpush3.msra.mxu1 %v2160_v25 }
  0x7c   :  { %1742 = vmatprep.subr.mxu0 %v2081_v0  ;;  %1769 = vmatprep.subr.mxu1 %v2081_v0 }
  0x7d   :  { %1743 = vmatpush3.msra.mxu0 %v2314_v58  ;;  %1770 = vmatpush3.msra.mxu1 %v2166_v28 }
  0x7e   :  { %1744 = vmatprep.subr.mxu0 %v2081_v0  ;;  %1771 = vmatprep.subr.mxu1 %v2081_v0 }
  0x7f   :  { %1745 = vmatpush3.msra.mxu0 %v2328_v52  ;;  %1772 = vmatpush3.msra.mxu1 %v2185_v35 }
  0x80   :  { %1746 = vmatprep.subr.mxu0 %v2081_v0  ;;  %1773 = vmatprep.subr.mxu1 %v2081_v0 }
  0x81   :  { %1747 = vmatpush3.msra.mxu0 %v2345_v7  ;;  %1774 = vmatpush3.msra.mxu1 %v2207_v45 }
  0x82   :  { %1748 = vmatprep.subr.mxu0 %v2081_v0  ;;  %1775 = vmatprep.subr.mxu1 %v2081_v0 }
  0x83   :  { %1749 = vmatpush3.msra.mxu0 %v2356_v36  ;;  %1750 = vmatprep.mubr.msk.f32.mxu0 %vm2082_vm0, %v2081_v0 }
  0x84   :  { %1776 = vmatpush3.msra.mxu1 %v2217_v48  ;;  %1751 = vmatmul.mubr.f32.vlgmr.msra.gmra.mxu0 %v2250_v62 }
  0x85   :  { %1777 = vmatprep.subr.mxu1 %v2081_v0  ;;  %1785 = vmatprep.mubr.msk.f32.mxu1 %vm2082_vm0, %v2081_v0 }
  0x86   :  { %1778 = vmatpush3.msra.mxu1 %v2244_v59  ;;  %1788 = vmatprep.subr.mxu0 %v2081_v0 }
  0x87   :  { %1779 = vmatprep.subr.mxu1 %v2081_v0  ;;  %1789 = vmatpush3.msra.mxu0 %v2119_v4 }
  0x88   :  { %1780 = vmatpush3.msra.mxu1 %v2254_v63  ;;  %1790 = vmatprep.subr.mxu0 %v2081_v0 }
  0x89   :  { %1781 = vmatprep.subr.mxu1 %v2081_v0  ;;  %1791 = vmatpush3.msra.mxu0 %v2121_v5 }
  0x8a   :  { %1782 = vmatpush3.msra.mxu1 %v2272_v13  ;;  %1792 = vmatprep.subr.mxu0 %v2081_v0 }
  0x8b   :  { %1783 = vmatprep.subr.mxu1 %v2081_v0  ;;  %1793 = vmatpush3.msra.mxu0 %v2123_v6 }
  0x8c   :  { %1784 = vmatpush3.msra.mxu1 %v2290_v32  ;;  %1794 = vmatprep.subr.mxu0 %v2081_v0 }
  0x8d   :  { %1786 = vmatmul.mubr.f32.vlgmr.msra.gmra.mxu1 %v2250_v62  ;;  %1823 = vmatprep.subr.mxu1 %v2081_v0  ;;  %v2791_v62 = vld [vmem:[#allocation15_spill] sm:$0xff] }
  0x8e   :  { %1824 = vmatpush3.msra.mxu1 %v2188_v37  ;;  %1795 = vmatpush3.msra.mxu0 %v2125_v10  ;;  %v2788_v37 = vld [vmem:[#allocation12_spill] sm:$0xff] }
  0x8f   :  { %1825 = vmatprep.subr.mxu1 %v2081_v0  ;;  %1796 = vmatprep.subr.mxu0 %v2081_v0 }
  0x90   :  { %1826 = vmatpush3.msra.mxu1 %v2190_v38  ;;  %1797 = vmatpush3.msra.mxu0 %v2127_v11  ;;  %v2789_v38 = vld [vmem:[#allocation13_spill] sm:$0xff] }
  0x91   :  { %1827 = vmatprep.subr.mxu1 %v2081_v0  ;;  %1798 = vmatprep.subr.mxu0 %v2081_v0 }
  0x92   :  { %1828 = vmatpush3.msra.mxu1 %v2205_v44  ;;  %1799 = vmatpush3.msra.mxu0 %v2129_v12  ;;  %v2790_v44 = vld [vmem:[#allocation14_spill] sm:$0xff] }
  0x93   :  { %1829 = vmatprep.subr.mxu1 %v2081_v0  ;;  %1800 = vmatprep.subr.mxu0 %v2081_v0 }
  0x94   :  { %1830 = vmatpush3.msra.mxu1 %v2788_v37  ;;  %1801 = vmatpush3.msra.mxu0 %v2138_v17 }
  0x95   :  { %1831 = vmatprep.subr.mxu1 %v2081_v0  ;;  %1802 = vmatprep.subr.mxu0 %v2081_v0 }
  0x96   :  { %1832 = vmatpush3.msra.mxu1 %v2789_v38  ;;  %1803 = vmatpush3.msra.mxu0 %v2160_v25 }
  0x97   :  { %1833 = vmatprep.subr.mxu1 %v2081_v0  ;;  %1804 = vmatprep.subr.mxu0 %v2081_v0 }
  0x98   :  { %1834 = vmatpush3.msra.mxu1 %v2790_v44  ;;  %1805 = vmatpush3.msra.mxu0 %v2166_v28 }
  0x99   :  { %1835 = vmatprep.subr.mxu1 %v2081_v0  ;;  %1806 = vmatprep.subr.mxu0 %v2081_v0 }
  0x9a   :  { %1836 = vmatpush3.msra.mxu1 %v2791_v62  ;;  %1807 = vmatpush3.msra.mxu0 %v2185_v35 }
  0x9b   :  { %1837 = vmatprep.subr.mxu1 %v2081_v0  ;;  %1808 = vmatprep.subr.mxu0 %v2081_v0 }
  0x9c   :  { %1838 = vmatpush3.msra.mxu1 %v2792_v1  ;;  %1809 = vmatpush3.msra.mxu0 %v2207_v45 }
  0x9d   :  { %1839 = vmatprep.subr.mxu1 %v2081_v0  ;;  %1810 = vmatprep.subr.mxu0 %v2081_v0 }
  0x9e   :  { %1840 = vmatpush3.msra.mxu1 %v2793_v26  ;;  %1811 = vmatpush3.msra.mxu0 %v2217_v48 }
  0x9f   :  { %1841 = vmatprep.subr.mxu1 %v2081_v0  ;;  %1812 = vmatprep.subr.mxu0 %v2081_v0 }
  0xa0   :  { %1842 = vmatpush3.msra.mxu1 %v2794_v42  ;;  %1855 = vmatprep.mubr.msk.f32.mxu1 %vm2082_vm0, %v2081_v0 }
  0xa1   :  { %1843 = vmatprep.subr.mxu1 %v2081_v0  ;;  %1813 = vmatpush3.msra.mxu0 %v2244_v59 }
  0xa2   :  { %1844 = vmatpush3.msra.mxu1 %v2337_v60  ;;  %1814 = vmatprep.subr.mxu0 %v2081_v0 }
  0xa3   :  { %1845 = vmatprep.subr.mxu1 %v2081_v0  ;;  %1815 = vmatpush3.msra.mxu0 %v2254_v63 }
  0xa4   :  { %1846 = vmatpush3.msra.mxu1 %v2351_v49  ;;  %1816 = vmatprep.subr.mxu0 %v2081_v0 }
  0xa5   :  { %1847 = vmatprep.subr.mxu1 %v2081_v0  ;;  %1817 = vmatpush3.msra.mxu0 %v2272_v13 }
  0xa6   :  { %1848 = vmatpush3.msra.mxu1 %v2362_v56  ;;  %1818 = vmatprep.subr.mxu0 %v2081_v0 }
  0xa7   :  { %1849 = vmatprep.subr.mxu1 %v2081_v0  ;;  %1819 = vmatpush3.msra.mxu0 %v2290_v32 }
  0xa8   :  { %1850 = vmatpush3.msra.mxu1 %v2370_v2  ;;  %1820 = vmatprep.mubr.msk.f32.mxu0 %vm2082_vm0, %v2081_v0 }
  0xa9   :  { %1851 = vmatprep.subr.mxu1 %v2081_v0  ;;  %1858 = vmatprep.subr.mxu0 %v2081_v0 }
  0xaa   :  { %1852 = vmatpush3.msra.mxu1 %v2377_v14 }
  0xab   :  { %1853 = vmatprep.subr.mxu1 %v2081_v0 }
  0xac   :  { %1854 = vmatpush3.msra.mxu1 %v2383_v33  ;;  %v2795_v33 = vld [vmem:[#allocation11_spill] sm:$0xff] }
  0xad   :  { %1893 = vmatprep.subr.mxu1 %v2081_v0 }
 0x102   :  { %v147_v56 = vpop.f32.mrf.mxu0 }
 0x104   :  { %v1612_v60 = vpop.f32.mrf.mxu0 }
 0x109   :  { %v298_v49 = vpop.f32.mrf.mxu1 }
 0x10a   :  { %v299_v62 = vadd.f32 %v298_v49, %v147_v56 }
 0x10b   :  { %v1647_v9 = vpop.f32.mrf.mxu1 }
 0x122   :  { %v402_v2 = vpop.f32.mrf.mxu0 }
 0x123   :  { %v403_v26 = vadd.f32 %v402_v2, %v299_v62 }
 0x124   :  { %v1682_v51 = vpop.f32.mrf.mxu0 }
 0x12b   :  { %v491_v37 = vpop.f32.mrf.mxu1 }
 0x12c   :  { %v492_v42 = vadd.f32 %v491_v37, %v403_v26 }
 0x12d   :  { %v1717_v38 = vpop.f32.mrf.mxu1 }
 0x144   :  { %v610_v44 = vpop.f32.mrf.mxu0 }
 0x145   :  { %v611_v14 = vadd.f32 %v610_v44, %v492_v42 }
 0x146   :  { %v1752_v1 = vpop.f32.mrf.mxu0 }
 0x14d   :  { %v697_v36 = vpop.f32.mrf.mxu1 }
 0x14e   :  { %v698_v7 = vadd.f32 %v697_v36, %v611_v14 }
 0x14f   :  { %v1787_v52 = vpop.f32.mrf.mxu1 }
 0x150   :  { %v2599_v58 = vsub.f32 %v2795_v33, %v698_v7 }
 0x152   :  { %v702_v60 = vmul.f32 %v2599_v58, %v2599_v58 }
 0x154   :  { %v2603_v9 = vand.u32 4294901760, %v702_v60 }
 0x156   :  { %v2606_v51 = vsub.f32 %v702_v60, %v2603_v9  ;;  %1856 = vmatmul.mubr.f32.vlgmr.msra.gmra.mxu1 %v2603_v9 }
 0x157   :  { %1894 = vmatpush3.msra.mxu1 %v2119_v4  ;;  %1925 = vmatprep.mubr.msk.f32.mxu1 %vm2082_vm0, %v2081_v0 }
 0x158   :  { %1895 = vmatprep.subr.mxu1 %v2081_v0  ;;  %v786_v52 = vand.u32 4294901760, %v2606_v51 }
 0x159   :  { %1896 = vmatpush3.msra.mxu1 %v2121_v5 }
 0x15a   :  { %1897 = vmatprep.subr.mxu1 %v2081_v0  ;;  %v787_v7 = vsub.f32 %v2606_v51, %v786_v52 }
 0x15b   :  { %1898 = vmatpush3.msra.mxu1 %v2123_v6 }
 0x15c   :  { %1899 = vmatprep.subr.mxu1 %v2081_v0  ;;  %v788_v36 = vand.u32 4294901760, %v787_v7 }
 0x15d   :  { %1900 = vmatpush3.msra.mxu1 %v2125_v10 }
 0x15e   :  { %1901 = vmatprep.subr.mxu1 %v2081_v0  ;;  %1821 = vmatmul.mubr.f32.vlgmr.msra.gmra.mxu0 %v788_v36 }
 0x15f   :  { %1859 = vmatpush3.msra.mxu0 %v2133_v15  ;;  %1902 = vmatpush3.msra.mxu1 %v2127_v11 }
 0x160   :  { %1860 = vmatprep.subr.mxu0 %v2081_v0  ;;  %1903 = vmatprep.subr.mxu1 %v2081_v0 }
 0x161   :  { %1861 = vmatpush3.msra.mxu0 %v2136_v16  ;;  %1904 = vmatpush3.msra.mxu1 %v2129_v12 }
 0x162   :  { %1862 = vmatprep.subr.mxu0 %v2081_v0  ;;  %1905 = vmatprep.subr.mxu1 %v2081_v0 }
 0x163   :  { %1863 = vmatpush3.msra.mxu0 %v2141_v18  ;;  %1906 = vmatpush3.msra.mxu1 %v2138_v17 }
 0x164   :  { %1864 = vmatprep.subr.mxu0 %v2081_v0  ;;  %1907 = vmatprep.subr.mxu1 %v2081_v0 }
 0x165   :  { %1865 = vmatpush3.msra.mxu0 %v2145_v20  ;;  %1908 = vmatpush3.msra.mxu1 %v2160_v25 }
 0x166   :  { %1866 = vmatprep.subr.mxu0 %v2081_v0  ;;  %1909 = vmatprep.subr.mxu1 %v2081_v0 }
 0x167   :  { %1867 = vmatpush3.msra.mxu0 %v2148_v21  ;;  %1910 = vmatpush3.msra.mxu1 %v2166_v28 }
 0x168   :  { %1868 = vmatprep.subr.mxu0 %v2081_v0  ;;  %1911 = vmatprep.subr.mxu1 %v2081_v0 }
 0x169   :  { %1869 = vmatpush3.msra.mxu0 %v2172_v30  ;;  %1912 = vmatpush3.msra.mxu1 %v2185_v35 }
 0x16a   :  { %1870 = vmatprep.subr.mxu0 %v2081_v0  ;;  %1913 = vmatprep.subr.mxu1 %v2081_v0 }
 0x16b   :  { %1871 = vmatpush3.msra.mxu0 %v2182_v34  ;;  %1914 = vmatpush3.msra.mxu1 %v2207_v45 }
 0x16c   :  { %1872 = vmatprep.subr.mxu0 %v2081_v0  ;;  %1915 = vmatprep.subr.mxu1 %v2081_v0 }
 0x16d   :  { %1873 = vmatpush3.msra.mxu0 %v2201_v43  ;;  %1916 = vmatpush3.msra.mxu1 %v2217_v48 }
 0x16e   :  { %1874 = vmatprep.subr.mxu0 %v2081_v0  ;;  %1917 = vmatprep.subr.mxu1 %v2081_v0 }
 0x16f   :  { %1875 = vmatpush3.msra.mxu0 %v2213_v47  ;;  %1918 = vmatpush3.msra.mxu1 %v2244_v59 }
 0x170   :  { %1876 = vmatprep.subr.mxu0 %v2081_v0  ;;  %1919 = vmatprep.subr.mxu1 %v2081_v0 }
 0x171   :  { %1877 = vmatpush3.msra.mxu0 %v2231_v55  ;;  %1920 = vmatpush3.msra.mxu1 %v2254_v63 }
 0x172   :  { %1878 = vmatprep.subr.mxu0 %v2081_v0  ;;  %1921 = vmatprep.subr.mxu1 %v2081_v0 }
 0x173   :  { %1879 = vmatpush3.msra.mxu0 %v2247_v61  ;;  %1922 = vmatpush3.msra.mxu1 %v2272_v13 }
 0x174   :  { %1880 = vmatprep.subr.mxu0 %v2081_v0  ;;  %1923 = vmatprep.subr.mxu1 %v2081_v0 }
 0x175   :  { %1881 = vmatpush3.msra.mxu0 %v2266_v8  ;;  %1924 = vmatpush3.msra.mxu1 %v2290_v32 }
 0x176   :  { %1882 = vmatprep.subr.mxu0 %v2081_v0  ;;  %1926 = vmatmul.mubr.f32.vlgmr.msra.gmra.mxu1 %v786_v52 }
 0x177   :  { %1963 = vmatprep.subr.mxu1 %v2081_v0  ;;  %1883 = vmatpush3.msra.mxu0 %v2286_v31 }
 0x178   :  { %1964 = vmatpush3.msra.mxu1 %v2119_v4  ;;  %1884 = vmatprep.subr.mxu0 %v2081_v0  ;;  %v2796_v4 = vld [vmem:[#allocation18_spill] sm:$0xff] }
 0x179   :  { %1965 = vmatprep.subr.mxu1 %v2081_v0  ;;  %1885 = vmatpush3.msra.mxu0 %v2302_v41 }
 0x17a   :  { %1966 = vmatpush3.msra.mxu1 %v2121_v5  ;;  %1886 = vmatprep.subr.mxu0 %v2081_v0  ;;  %v2797_v5 = vld [vmem:[#allocation20_spill] sm:$0xff] }
 0x17b   :  { %1967 = vmatprep.subr.mxu1 %v2081_v0  ;;  %1887 = vmatpush3.msra.mxu0 %v2317_v54 }
 0x17c   :  { %1968 = vmatpush3.msra.mxu1 %v2123_v6  ;;  %1888 = vmatprep.subr.mxu0 %v2081_v0  ;;  %v2798_v6 = vld [vmem:[#allocation21_spill] sm:$0xff] }
 0x17d   :  { %1969 = vmatprep.subr.mxu1 %v2081_v0  ;;  %1889 = vmatpush3.msra.mxu0 %v2331_v50 }
 0x17e   :  { %1890 = vmatprep.mubr.msk.f32.mxu0 %vm2082_vm0, %v2081_v0  ;;  %1970 = vmatpush3.msra.mxu1 %v2125_v10  ;;  %v2799_v10 = vld [vmem:[#allocation22_spill] sm:$0xff] }
 0x17f   :  { %1891 = vmatmul.mubr.f32.vlgmr.msra.gmra.mxu0 %v2606_v51  ;;  %1928 = vmatprep.subr.mxu0 %v2081_v0 }
 0x180   :  { %1971 = vmatprep.subr.mxu1 %v2081_v0  ;;  %1929 = vmatpush3.msra.mxu0 %v2152_v22 }
 0x181   :  { %1972 = vmatpush3.msra.mxu1 %v2127_v11  ;;  %1930 = vmatprep.subr.mxu0 %v2081_v0 }
 0x182   :  { %1973 = vmatprep.subr.mxu1 %v2081_v0  ;;  %1931 = vmatpush3.msra.mxu0 %v2155_v23 }
 0x183   :  { %1974 = vmatpush3.msra.mxu1 %v2129_v12  ;;  %1932 = vmatprep.subr.mxu0 %v2081_v0 }
 0x184   :  { %1975 = vmatprep.subr.mxu1 %v2081_v0  ;;  %1933 = vmatpush3.msra.mxu0 %v2158_v24 }
 0x185   :  { %1976 = vmatpush3.msra.mxu1 %v2138_v17  ;;  %1934 = vmatprep.subr.mxu0 %v2081_v0 }
 0x186   :  { %1977 = vmatprep.subr.mxu1 %v2081_v0  ;;  %1935 = vmatpush3.msra.mxu0 %v2164_v27 }
 0x187   :  { %1978 = vmatpush3.msra.mxu1 %v2160_v25  ;;  %1936 = vmatprep.subr.mxu0 %v2081_v0 }
 0x188   :  { %1979 = vmatprep.subr.mxu1 %v2081_v0  ;;  %1937 = vmatpush3.msra.mxu0 %v2169_v29 }
 0x189   :  { %1980 = vmatpush3.msra.mxu1 %v2166_v28  ;;  %1938 = vmatprep.subr.mxu0 %v2081_v0 }
 0x18a   :  { %1981 = vmatprep.subr.mxu1 %v2081_v0  ;;  %1939 = vmatpush3.msra.mxu0 %v2195_v40  ;;  %v1373_v40 = vld [vmem:[%s2760_s2] ss:$0 sm:$0xff] }
 0x18b   :  { %1982 = vmatpush3.msra.mxu1 %v2185_v35  ;;  %1940 = vmatprep.subr.mxu0 %v2081_v0 }
 0x18c   :  { %1983 = vmatprep.subr.mxu1 %v2081_v0  ;;  %1941 = vmatpush3.msra.mxu0 %v2210_v46 }
 0x18d   :  { %1984 = vmatpush3.msra.mxu1 %v2207_v45  ;;  %1942 = vmatprep.subr.mxu0 %v2081_v0 }
 0x18e   :  { %1985 = vmatprep.subr.mxu1 %v2081_v0  ;;  %1943 = vmatpush3.msra.mxu0 %v2228_v53 }
 0x18f   :  { %1986 = vmatpush3.msra.mxu1 %v2217_v48  ;;  %1944 = vmatprep.subr.mxu0 %v2081_v0 }
 0x190   :  { %1987 = vmatprep.subr.mxu1 %v2081_v0  ;;  %1945 = vmatpush3.msra.mxu0 %v2238_v57 }
 0x191   :  { %1988 = vmatpush3.msra.mxu1 %v2244_v59  ;;  %1946 = vmatprep.subr.mxu0 %v2081_v0 }
 0x192   :  { %1989 = vmatprep.subr.mxu1 %v2081_v0  ;;  %1947 = vmatpush3.msra.mxu0 %v2263_v3 }
 0x193   :  { %1990 = vmatpush3.msra.mxu1 %v2254_v63  ;;  %1948 = vmatprep.subr.mxu0 %v2081_v0 }
 0x194   :  { %1991 = vmatprep.subr.mxu1 %v2081_v0  ;;  %1949 = vmatpush3.msra.mxu0 %v2279_v19 }
 0x195   :  { %1992 = vmatpush3.msra.mxu1 %v2272_v13  ;;  %1950 = vmatprep.subr.mxu0 %v2081_v0 }
 0x196   :  { %1993 = vmatprep.subr.mxu1 %v2081_v0  ;;  %1951 = vmatpush3.msra.mxu0 %v2299_v39 }
 0x197   :  { %1994 = vmatpush3.msra.mxu1 %v2290_v32  ;;  %1995 = vmatprep.mubr.msk.f32.mxu1 %vm2082_vm0, %v2081_v0 }
 0x198   :  { %1952 = vmatprep.subr.mxu0 %v2081_v0  ;;  %1996 = vmatmul.mubr.f32.vlgmr.msra.gmra.mxu1 %v2603_v9 }
 0x199   :  { %1953 = vmatpush3.msra.mxu0 %v2796_v4  ;;  %1960 = vmatprep.mubr.msk.f32.mxu0 %vm2082_vm0, %v2081_v0 }
 0x19a   :  { %1954 = vmatprep.subr.mxu0 %v2081_v0 }
 0x19b   :  { %1955 = vmatpush3.msra.mxu0 %v2797_v5 }
 0x19c   :  { %1956 = vmatprep.subr.mxu0 %v2081_v0 }
 0x19d   :  { %1957 = vmatpush3.msra.mxu0 %v2798_v6 }
 0x19e   :  { %1958 = vmatprep.subr.mxu0 %v2081_v0 }
 0x19f   :  { %1959 = vmatpush3.msra.mxu0 %v2799_v10 }
 0x1a0   :  { %1961 = vmatmul.mubr.f32.vlgmr.msra.gmra.mxu0 %v2603_v9 }
 0x216   :  { %v941_v11 = vpop.f32.mrf.mxu1 }
 0x218   :  { %v1857_v12 = vpop.f32.mrf.mxu1 }
 0x21e   :  { %v790_v15 = vpop.f32.mrf.mxu0 }
 0x21f   :  { %v791_v22 = vadd.f32 1e-05, %v790_v15 }
 0x220   :  { %v1822_v16 = vpop.f32.mrf.mxu0 }
 0x221   :  { %v942_v24 = vadd.f32 %v941_v11, %v791_v22 }
 0x236   :  { %v1134_v17 = vpop.f32.mrf.mxu1 }
 0x238   :  { %v1927_v18 = vpop.f32.mrf.mxu1 }
 0x23f   :  { %v1045_v20 = vpop.f32.mrf.mxu0 }
 0x240   :  { %v1046_v27 = vadd.f32 %v1045_v20, %v942_v24 }
 0x241   :  { %v1892_v21 = vpop.f32.mrf.mxu0 }
 0x242   :  { %v1135_v28 = vadd.f32 %v1134_v17, %v1046_v27 }
 0x258   :  { %v1340_v23 = vpop.f32.mrf.mxu1 }
 0x25a   :  { %v1997_v25 = vpop.f32.mrf.mxu1 }
 0x260   :  { %v1253_v29 = vpop.f32.mrf.mxu0 }
 0x261   :  { %v1254_v0 = vadd.f32 %v1253_v29, %v1135_v28 }
 0x262   :  { %v1962_v30 = vpop.f32.mrf.mxu0 }
 0x263   :  { %v1341_v34 = vadd.f32 %v1340_v23, %v1254_v0 }
 0x265   :  { %2007 = vrsqrt.f32 %v1341_v34 }
 0x272   :  { %v2008_v35 = vpop.eup %2007 }
 0x273   :  { %v1345_v43 = vmul.f32 %v2008_v35, %v2599_v58 }
 0x275   :  { %v1353_v45 = vmul.f32 %v1373_v40, %v1345_v43 }
 0x277   :  { %1354 = vst [vmem:[#allocation7] sm:$0xff] %v1353_v45 }
 0x278   :  { %1359 = vsyncadd [#allocation4], 64  ;;  %s2083_s27 = smov [#allocation7]  }
 0x279   :  { %s1360_s28 = sshll.u32 %s2083_s27, 4  ;;  %s1361_s28 = int_to_ptr.vmem [resolvable:$true] %s1360_s28 }
 0x27a   :  { %s2049_s29 = scalar_lea.vmem %s1361_s28, 64  ;;  %s2053_s30 = scalar_lea.vmem %s1361_s28, 128 }
 0x27b   :  { %p2050_p10 = scmp.ne.s32.totalorder %s1361_s28, %s2049_s29  ;;  %p2054_p11 = scmp.lt.s32.totalorder %s1361_s28, %s1361_s28 }
 0x27c   :  { %p2055_p12 = scmp.lt.s32.totalorder %s2053_s30, %s2049_s29 }
 0x27e   :  { %p2056_p13 = por %p2055_p12, %p2054_p11 }
 0x280   :  { %p2057_p0 = pnand %p2056_p13, %p2050_p10 }
 0x282   :  { %2060 = shalt.err (!%p2057_p0)
}
 0x283   :  { %1366 = dma.vmem_to_hbm [thread:$0]  %s1361_s28, 64, %s2761_s3, [#allocation4], %s2076_s16, %s2076_s16, %s2077_s17  }
 0x284   :  { %2073 = dma.done.wait [#allocation4], 128  }
 0x285   :  { %2074 = vsyncadd [#allocation4], 4294967168 }
 0x286   :  { %1370 = vsyncpa [#allocation3], 1 }
 0x287   :  { %1371 = vsyncpa [#allocation6], 1 }
 0x288   :  { %1372 = vsyncpa [#allocation4], 1 }

</bundles_post_ra>
